<compile_context>
chip_gen: v7x
topology: tpu7x:2x2x1
jax: 0.10.0
libtpu: 0.0.40
codegen_flags: <defaults>
</compile_context>

<pallas_src>
import jax
import jax.numpy as jnp
from jax.experimental import pallas as pl
from jax.experimental.pallas import tpu as pltpu

B = 5            # batch per input
D_IN = 50        # linear  in
D1 = 25          # linear  out
D2 = 12          # linear2 out
D3 = 5           # linear3 out
D_CAT = D1 + D2 + D3          # 42  (per-chain composed affine width)
D_OUT = 3 * D_CAT             # 126 (final concat width)
D_PAD = 128                   # lane-padded kernel output width


def _model_kernel(x1_ref, x2_ref, x3_ref, w1_ref, w2_ref, w3_ref, b_ref, out_ref):
    # Permutation + 3-layer composition are baked into w*_ref at param-prep time,
    # so the body is: three (5,50)@(50,128) MXU pushes, one bias add, one store.
    acc = jnp.dot(x1_ref[...], w1_ref[...], preferred_element_type=jnp.float32)
    acc = acc + jnp.dot(x2_ref[...], w2_ref[...], preferred_element_type=jnp.float32)
    acc = acc + jnp.dot(x3_ref[...], w3_ref[...], preferred_element_type=jnp.float32)
    out_ref[...] = acc + b_ref[...]


def prepare_params(params):
    """One-time parameter prep (NOT in the hot path).

    Folds linear -> linear2 -> linear3 into composed affine maps
        y1 = x @ Wa + ba   (25),  y2 = x @ Wb + bb   (12),  y3 = x @ Wc + bc   (5)
    and scatters Wa/Wb/Wc (and ba/bb/bc) directly into each chain's column offsets of
    the final [v1 v2 v3 | v4 v5 v6 | v7 v8 v9] layout, zero-padded to 128 lanes.
    Returns three (50, 128) per-chain weights and one (1, 128) bias.
    """
    w1, b1, w2, b2, w3, b3 = params
    wa = w1.T.astype(jnp.float32)            # (50, 25)  x -> v1/v2/v3
    wb = wa @ w2.T                            # (50, 12)  x -> v4/v5/v6
    wc = wb @ w3.T                            # (50, 5)   x -> v7/v8/v9
    ba = b1                                   # (25,)
    bb = b1 @ w2.T + b2                       # (12,)
    bc = bb @ w3.T + b3                       # (5,)

    off1 = 0          # v1/v2/v3 block start
    off2 = 3 * D1     # v4/v5/v6 block start (75)
    off3 = 3 * D1 + 3 * D2  # v7/v8/v9 block start (111)

    w_chains = []
    bias = jnp.zeros((1, D_PAD), jnp.float32)
    for c in range(3):
        w = jnp.zeros((D_IN, D_PAD), jnp.float32)
        w = w.at[:, off1 + c * D1: off1 + (c + 1) * D1].set(wa)
        w = w.at[:, off2 + c * D2: off2 + (c + 1) * D2].set(wb)
        w = w.at[:, off3 + c * D3: off3 + (c + 1) * D3].set(wc)
        w_chains.append(w)
        bias = bias.at[0, off1 + c * D1: off1 + (c + 1) * D1].set(ba)
        bias = bias.at[0, off2 + c * D2: off2 + (c + 1) * D2].set(bb)
        bias = bias.at[0, off3 + c * D3: off3 + (c + 1) * D3].set(bc)
    return w_chains[0], w_chains[1], w_chains[2], bias


@jax.jit
def model_forward(x1, x2, x3, w1c, w2c, w3c, b_pad):
    vmem = pl.BlockSpec(memory_space=pltpu.MemorySpace.VMEM)
    cost = pl.CostEstimate(
        flops=2 * 3 * B * D_IN * D_PAD,
        transcendentals=0,
        bytes_accessed=4 * (3 * B * D_IN + 3 * D_IN * D_PAD + D_PAD + B * D_PAD),
    )
    out_padded = pl.pallas_call(
        _model_kernel,
        out_shape=jax.ShapeDtypeStruct((B, D_PAD), jnp.float32),
        in_specs=[vmem] * 7,
        out_specs=vmem,
        cost_estimate=cost,
    )(x1, x2, x3, w1c, w2c, w3c, b_pad)
    # Columns 126:128 are structurally zero (zero weight/bias columns); trim them.
    return out_padded[:, :D_OUT]


def init_params(key):
    # Deterministic init mimicking torch.nn.Linear (uniform(-1/sqrt(in), 1/sqrt(in))).
    ks = jax.random.split(key, 6)

    def lin_init(kw, kb, din, dout):
        bound = 1.0 / jnp.sqrt(jnp.float32(din))
        w = jax.random.uniform(kw, (dout, din), jnp.float32, -bound, bound)
        b = jax.random.uniform(kb, (dout,), jnp.float32, -bound, bound)
        return w, b

    w1, b1 = lin_init(ks[0], ks[1], D_IN, D1)
    w2, b2 = lin_init(ks[2], ks[3], D1, D2)
    w3, b3 = lin_init(ks[4], ks[5], D2, D3)
    return (w1, b1, w2, b2, w3, b3)


def reference_forward(x1, x2, x3, params):
    # Layer-by-layer reference (same shape-consistent interpretation).
    w1, b1, w2, b2, w3, b3 = params
    lin = lambda x, w, b: x @ w.T + b
    v1, v2, v3 = lin(x1, w1, b1), lin(x2, w1, b1), lin(x3, w1, b1)
    v4, v5, v6 = lin(v1, w2, b2), lin(v2, w2, b2), lin(v3, w2, b2)
    v7, v8, v9 = lin(v4, w3, b3), lin(v5, w3, b3), lin(v6, w3, b3)
    return jnp.concatenate([v1, v2, v3, v4, v5, v6, v7, v8, v9], axis=1)


if __name__ == "__main__":
    key = jax.random.PRNGKey(0)
    k_in, k_par = jax.random.split(key)
    k1, k2, k3 = jax.random.split(k_in, 3)

    x1 = jax.random.normal(k1, (B, D_IN), jnp.float32)
    x2 = jax.random.normal(k2, (B, D_IN), jnp.float32)
    x3 = jax.random.normal(k3, (B, D_IN), jnp.float32)
    params = init_params(k_par)

    # One-time parameter preparation (all transposes, layer folding, output
    # permutation and lane padding happen here, not in the per-call path).
    w1c, w2c, w3c, b_pad = prepare_params(params)

    out = model_forward(x1, x2, x3, w1c, w2c, w3c, b_pad)
    out = jax.block_until_ready(out)

    ref = reference_forward(x1, x2, x3, params)
    assert out.shape == (B, D_OUT), out.shape
    assert jnp.allclose(out, ref, atol=1e-4, rtol=1e-4), float(jnp.max(jnp.abs(out - ref)))

    print("KERNEL_OK")
</pallas_src>

<mosaic_0001>
module attributes {stable_mosaic.version = 11 : i64} {
  func.func @_model_kernel(%arg0: memref<5x50xf32, #tpu.memory_space<vmem>>, %arg1: memref<5x50xf32, #tpu.memory_space<vmem>>, %arg2: memref<5x50xf32, #tpu.memory_space<vmem>>, %arg3: memref<50x128xf32, #tpu.memory_space<vmem>>, %arg4: memref<50x128xf32, #tpu.memory_space<vmem>>, %arg5: memref<50x128xf32, #tpu.memory_space<vmem>>, %arg6: memref<1x128xf32, #tpu.memory_space<vmem>>, %arg7: memref<5x128xf32, #tpu.memory_space<vmem>>) attributes {dimension_semantics = [], scalar_prefetch = 0 : i64, scratch_operands = 0 : i64, tpu.core_type = #tpu.core_type<tc>} {
    %c0 = arith.constant 0 : index
    %c0_0 = arith.constant 0 : index
    %0 = vector.load %arg0[%c0, %c0_0] : memref<5x50xf32, #tpu.memory_space<vmem>>, vector<5x50xf32>
    %c0_1 = arith.constant 0 : index
    %c0_2 = arith.constant 0 : index
    %1 = vector.load %arg3[%c0_1, %c0_2] : memref<50x128xf32, #tpu.memory_space<vmem>>, vector<50x128xf32>
    %cst = arith.constant dense<0.000000e+00> : vector<5x128xf32>
    %2 = tpu.matmul %0, %1, %cst {dimension_numbers = #tpu.dot_dimension_numbers<[1], [0], [0], [1], [0, 0, 1, 1], [], []>} : vector<5x50xf32>, vector<50x128xf32>, vector<5x128xf32> -> vector<5x128xf32>
    %c0_3 = arith.constant 0 : index
    %c0_4 = arith.constant 0 : index
    %3 = vector.load %arg1[%c0_3, %c0_4] : memref<5x50xf32, #tpu.memory_space<vmem>>, vector<5x50xf32>
    %c0_5 = arith.constant 0 : index
    %c0_6 = arith.constant 0 : index
    %4 = vector.load %arg4[%c0_5, %c0_6] : memref<50x128xf32, #tpu.memory_space<vmem>>, vector<50x128xf32>
    %cst_7 = arith.constant dense<0.000000e+00> : vector<5x128xf32>
    %5 = tpu.matmul %3, %4, %cst_7 {dimension_numbers = #tpu.dot_dimension_numbers<[1], [0], [0], [1], [0, 0, 1, 1], [], []>} : vector<5x50xf32>, vector<50x128xf32>, vector<5x128xf32> -> vector<5x128xf32>
    %6 = arith.addf %2, %5 : vector<5x128xf32>
    %c0_8 = arith.constant 0 : index
    %c0_9 = arith.constant 0 : index
    %7 = vector.load %arg2[%c0_8, %c0_9] : memref<5x50xf32, #tpu.memory_space<vmem>>, vector<5x50xf32>
    %c0_10 = arith.constant 0 : index
    %c0_11 = arith.constant 0 : index
    %8 = vector.load %arg5[%c0_10, %c0_11] : memref<50x128xf32, #tpu.memory_space<vmem>>, vector<50x128xf32>
    %cst_12 = arith.constant dense<0.000000e+00> : vector<5x128xf32>
    %9 = tpu.matmul %7, %8, %cst_12 {dimension_numbers = #tpu.dot_dimension_numbers<[1], [0], [0], [1], [0, 0, 1, 1], [], []>} : vector<5x50xf32>, vector<50x128xf32>, vector<5x128xf32> -> vector<5x128xf32>
    %10 = arith.addf %6, %9 : vector<5x128xf32>
    %c0_13 = arith.constant 0 : index
    %c0_14 = arith.constant 0 : index
    %11 = vector.load %arg6[%c0_13, %c0_14] : memref<1x128xf32, #tpu.memory_space<vmem>>, vector<1x128xf32>
    %12 = vector.broadcast %11 : vector<1x128xf32> to vector<5x128xf32>
    %13 = arith.addf %10, %12 : vector<5x128xf32>
    %c0_15 = arith.constant 0 : index
    %c0_16 = arith.constant 0 : index
    %14 = vector.load %arg7[%c0_15, %c0_16] : memref<5x128xf32, #tpu.memory_space<vmem>>, vector<5x128xf32>
    tpu.vector_store %arg7[%c0_15, %c0_16], %13 {strides = array<i32>} : memref<5x128xf32, #tpu.memory_space<vmem>>, vector<5x128xf32>,
    return
  }
}

</mosaic_0001>

<bundles_post_ra>
// kernel: model_forward.1
= control target key start
LH: loop header
LB: loop body
LE: loop exit
PB: predicated region body
PF: predicated region fallthrough
CT: control target
= control target key end

     0   :  { %12 = vsyncpa [#allocation3], 0  ;;  %s841_s0 = inlined_call_operand.hbm [shape: f32[5,50], index: 0, kind: input, shape index: {}]   ;;  %s842_s1 = inlined_call_operand.hbm [shape: f32[5,50], index: 1, kind: input, shape index: {}]   ;;  %s843_s2 = inlined_call_operand.hbm [shape: f32[5,50], index: 2, kind: input, shape index: {}]   ;;  %s844_s3 = inlined_call_operand.hbm [shape: f32[50,128], index: 3, kind: input, shape index: {}]   ;;  %s845_s4 = inlined_call_operand.hbm [shape: f32[50,128], index: 4, kind: input, shape index: {}]   ;;  %s846_s5 = inlined_call_operand.hbm [shape: f32[50,128], index: 5, kind: input, shape index: {}]   ;;  %s847_s6 = inlined_call_operand.vmem [shape: f32[1,128], index: 6, kind: input, shape index: {}]   ;;  %s848_s7 = inlined_call_operand.hbm [shape: f32[5,128], index: 7, kind: output, shape index: {}]  }
   0x1   :  { %13 = vsyncpa [#allocation6], 0 }
   0x2   :  { %14 = vsyncpa [#allocation9], 0 }
   0x3   :  { %15 = vsyncpa [#allocation12], 0 }
   0x4   :  { %16 = vsyncpa [#allocation4], 0  ;;  %s670_s24 = smov [#allocation5]   ;;  %s671_s26 = smov [#allocation8]  }
   0x5   :  { %s33_s25 = sshll.u32 %s670_s24, 4  ;;  %s52_s27 = sshll.u32 %s671_s26, 4  ;;  %s34_s25 = int_to_ptr.vmem [resolvable:$true] %s33_s25  ;;  %s722_s27 = int_to_ptr.vmem [resolvable:$true] %s52_s27 }
   0x6   :  { %s506_s30 = scalar_lea.hbm %s842_s1, 128 }
   0x7   :  { %p507_p0 = scmp.ne.s32.totalorder %s842_s1, %s506_s30  ;;  %p510_p1 = scmp.lt.u32.totalorder %s506_s30, %s842_s1 }
   0x9   :  { %p512_p2 = pnand %p510_p1, %p507_p0 }
   0xb   :  { %515 = shalt.err (!%p512_p2)
}
   0xc   :  { %s516_s12 = scalar_lea.vmem %s34_s25, 128  ;;  %p521_p4 = scmp.lt.s32.totalorder %s34_s25, %s34_s25 }
   0xd   :  { %p517_p3 = scmp.ne.s32.totalorder %s34_s25, %s516_s12  ;;  %p522_p5 = scmp.lt.s32.totalorder %s516_s12, %s516_s12 }
   0xf   :  { %p523_p6 = por %p522_p5, %p521_p4 }
  0x11   :  { %p524_p7 = pnand %p523_p6, %p517_p3 }
  0x13   :  { %527 = shalt.err (!%p524_p7)
}
  0x14   :  { %36 = dma.hbm_to_vmem [thread:$0]  %s842_s1, 128, %s34_s25, [#allocation6]  }
  0x15   :  { %s528_s17 = scalar_lea.hbm %s844_s3, 896 }
  0x16   :  { %p529_p8 = scmp.ne.s32.totalorder %s844_s3, %s528_s17  ;;  %p532_p9 = scmp.lt.u32.totalorder %s528_s17, %s844_s3 }
  0x18   :  { %p534_p10 = pnand %p532_p9, %p529_p8 }
  0x1a   :  { %537 = shalt.err (!%p534_p10)
}
  0x1b   :  { %s538_s22 = scalar_lea.vmem %s722_s27, 896  ;;  %p543_p12 = scmp.lt.s32.totalorder %s722_s27, %s722_s27 }
  0x1c   :  { %p539_p11 = scmp.ne.s32.totalorder %s722_s27, %s538_s22  ;;  %p544_p13 = scmp.lt.s32.totalorder %s538_s22, %s538_s22 }
  0x1e   :  { %p545_p0 = por %p544_p13, %p543_p12 }
  0x20   :  { %p546_p1 = pnand %p545_p0, %p539_p11 }
  0x22   :  { %549 = shalt.err (!%p546_p1)
}
  0x23   :  { %s672_s1 = smov 128   ;;  %s673_s23 = smov 8  }
  0x24   :  { %58 = dma.hbm_to_vmem [thread:$0]  %s844_s3, 896, %s722_s27, [#allocation9], %s672_s1, %s672_s1, %s673_s23  }
  0x25   :  { %s674_s26 = smov [#allocation2]   ;;  %s675_s29 = smov [#allocation7]  }
  0x26   :  { %s23_s28 = sshll.u32 %s674_s26, 4  ;;  %s43_s30 = sshll.u32 %s675_s29, 4  ;;  %s24_s28 = int_to_ptr.vmem [resolvable:$true] %s23_s28  ;;  %s44_s30 = int_to_ptr.vmem [resolvable:$true] %s43_s30 }
  0x27   :  { %s550_s10 = scalar_lea.hbm %s841_s0, 128 }
  0x28   :  { %p551_p2 = scmp.ne.s32.totalorder %s841_s0, %s550_s10  ;;  %p554_p3 = scmp.lt.u32.totalorder %s550_s10, %s841_s0 }
  0x2a   :  { %p556_p4 = pnand %p554_p3, %p551_p2 }
  0x2c   :  { %559 = shalt.err (!%p556_p4)
}
  0x2d   :  { %s560_s3 = scalar_lea.vmem %s24_s28, 128  ;;  %p565_p6 = scmp.lt.s32.totalorder %s24_s28, %s24_s28 }
  0x2e   :  { %p561_p5 = scmp.ne.s32.totalorder %s24_s28, %s560_s3  ;;  %p566_p7 = scmp.lt.s32.totalorder %s560_s3, %s560_s3 }
  0x30   :  { %p567_p8 = por %p566_p7, %p565_p6 }
  0x32   :  { %p568_p9 = pnand %p567_p8, %p561_p5 }
  0x34   :  { %571 = shalt.err (!%p568_p9)
}
  0x35   :  { %26 = dma.hbm_to_vmem [thread:$0]  %s841_s0, 128, %s24_s28, [#allocation3]  }
  0x36   :  { %s572_s18 = scalar_lea.hbm %s843_s2, 128 }
  0x37   :  { %p573_p10 = scmp.ne.s32.totalorder %s843_s2, %s572_s18  ;;  %p576_p11 = scmp.lt.u32.totalorder %s572_s18, %s843_s2 }
  0x39   :  { %p578_p12 = pnand %p576_p11, %p573_p10 }
  0x3b   :  { %581 = shalt.err (!%p578_p12)
}
  0x3c   :  { %s582_s24 = scalar_lea.vmem %s44_s30, 128  ;;  %p587_p0 = scmp.lt.s32.totalorder %s44_s30, %s44_s30 }
  0x3d   :  { %p583_p13 = scmp.ne.s32.totalorder %s44_s30, %s582_s24  ;;  %p588_p1 = scmp.lt.s32.totalorder %s582_s24, %s582_s24 }
  0x3f   :  { %p589_p2 = por %p588_p1, %p587_p0 }
  0x41   :  { %p590_p3 = pnand %p589_p2, %p583_p13 }
  0x43   :  { %593 = shalt.err (!%p590_p3)
}
  0x44   :  { %46 = dma.hbm_to_vmem [thread:$0]  %s843_s2, 128, %s44_s30, [#allocation6]  }
  0x45   :  { %s676_s26 = smov [#allocation10]   ;;  %s677_s29 = smov [#allocation11]  }
  0x46   :  { %s64_s28 = sshll.u32 %s676_s26, 4  ;;  %s76_s8 = sshll.u32 %s677_s29, 4  ;;  %s65_s28 = int_to_ptr.vmem [resolvable:$true] %s64_s28  ;;  %s780_s8 = int_to_ptr.vmem [resolvable:$true] %s76_s8 }
  0x47   :  { %s594_s11 = scalar_lea.hbm %s845_s4, 896 }
  0x48   :  { %p595_p4 = scmp.ne.s32.totalorder %s845_s4, %s594_s11  ;;  %p598_p5 = scmp.lt.u32.totalorder %s594_s11, %s845_s4 }
  0x4a   :  { %p600_p6 = pnand %p598_p5, %p595_p4 }
  0x4c   :  { %603 = shalt.err (!%p600_p6)
}
  0x4d   :  { %s604_s2 = scalar_lea.vmem %s65_s28, 896  ;;  %p609_p8 = scmp.lt.s32.totalorder %s65_s28, %s65_s28 }
  0x4e   :  { %p605_p7 = scmp.ne.s32.totalorder %s65_s28, %s604_s2  ;;  %p610_p9 = scmp.lt.s32.totalorder %s604_s2, %s604_s2 }
  0x50   :  { %p611_p10 = por %p610_p9, %p609_p8 }
  0x52   :  { %p612_p11 = pnand %p611_p10, %p605_p7 }
  0x54   :  { %615 = shalt.err (!%p612_p11)
}
  0x55   :  { %70 = dma.hbm_to_vmem [thread:$0]  %s845_s4, 896, %s65_s28, [#allocation9], %s672_s1, %s672_s1, %s673_s23  }
  0x56   :  { %s616_s17 = scalar_lea.hbm %s846_s5, 896 }
  0x57   :  { %p617_p12 = scmp.ne.s32.totalorder %s846_s5, %s616_s17  ;;  %p620_p13 = scmp.lt.u32.totalorder %s616_s17, %s846_s5 }
  0x59   :  { %p622_p0 = pnand %p620_p13, %p617_p12 }
  0x5b   :  { %625 = shalt.err (!%p622_p0)
}
  0x5c   :  { %s626_s22 = scalar_lea.vmem %s780_s8, 896  ;;  %p631_p2 = scmp.lt.s32.totalorder %s780_s8, %s780_s8 }
  0x5d   :  { %p627_p1 = scmp.ne.s32.totalorder %s780_s8, %s626_s22  ;;  %p632_p3 = scmp.lt.s32.totalorder %s626_s22, %s626_s22 }
  0x5f   :  { %p633_p4 = por %p632_p3, %p631_p2 }
  0x61   :  { %p634_p5 = pnand %p633_p4, %p627_p1 }
  0x63   :  { %637 = shalt.err (!%p634_p5)
}
  0x64   :  { %82 = dma.hbm_to_vmem [thread:$0]  %s846_s5, 896, %s780_s8, [#allocation12], %s672_s1, %s672_s1, %s673_s23  }
  0x65   :  { %660 = dma.done.wait [#allocation3], 128  }
  0x66   :  { %661 = vsyncadd [#allocation3], 4294967168 }
  0x67   :  { %662 = dma.done.wait [#allocation6], 256  }
  0x68   :  { %663 = vsyncadd [#allocation6], 4294967040 }
  0x69   :  { %664 = dma.done.wait [#allocation9], 1792  }
  0x6a   :  { %665 = vsyncadd [#allocation9], 4294965504 }
  0x6b   :  { %666 = dma.done.wait [#allocation12], 896  }
  0x6c   :  { %667 = vsyncadd [#allocation12], 4294966400  ;;  %v678_v0 = vmov 0.0|0.0   ;;  %vm679_vm0 = vmmov 0   ;;  %v680_v1 = vmov 0.0   ;;  %v112_v2 = vld [vmem:[#allocation10] sm:$0xff] }
  0x6d   :  { %467 = vmatprep.subr.bf16.mxu0 %v678_v0  ;;  %476 = vmatprep.subr.bf16.mxu1 %v678_v0  ;;  %v113_v3 = vld [vmem:[#allocation10 + $0x8] sm:$0xff]  ;;  %v105_v6 = vld [vmem:[#allocation8 + $0x8] sm:$0xff]  ;;  %v115_v8 = vld [vmem:[#allocation10 + $0x18] sm:$0xff]  ;;  %vm123_vm1 = vcmask 1041408   ;;  %vm119_vm2 = vcmask 408576   ;;  %s681_s23 = smov [#allocation13]  }
  0x6e   :  { %430 = vmatprep.mubr.msk.f32.mxu0 %vm679_vm0, %v680_v1  ;;  %447 = vmatprep.mubr.msk.f32.mxu1 %vm679_vm0, %v680_v1  ;;  %v104_v4 = vld [vmem:[#allocation8] sm:$0xff]  ;;  %v468_v5 = vpack.c.bf16 %v113_v3, %v112_v2  ;;  %v114_v7 = vld [vmem:[#allocation10 + $0x10] sm:$0xff]  ;;  %v106_v10 = vld [vmem:[#allocation8 + $0x10] sm:$0xff]  ;;  %s373_s0 = sshll.u32 %s681_s23, 4  ;;  %s374_s0 = int_to_ptr.vmem [resolvable:$true] %s373_s0 }
  0x6f   :  { %v477_v9 = vpack.c.bf16 %v105_v6, %v104_v4  ;;  %v107_v11 = vld [vmem:[#allocation8 + $0x18] sm:$0xff]  ;;  %v471_v12 = vpack.c.bf16 %v115_v8, %v114_v7  ;;  %v117_v15 = vld [vmem:[#allocation10 + $0x28] sm:$0xff]  ;;  %v109_v17 = vld [vmem:[#allocation8 + $0x28] sm:$0xff]  ;;  %s638_s25 = scalar_lea.vmem %s374_s0, 128  ;;  %p643_p7 = scmp.lt.s32.totalorder %s374_s0, %s374_s0 }
  0x70   :  { %469 = vmatpush3.bf16.msra.mxu0 %v468_v5  ;;  %v480_v13 = vpack.c.bf16 %v107_v11, %v106_v10  ;;  %v116_v14 = vld [vmem:[#allocation10 + $0x20] sm:$0xff]  ;;  %v108_v16 = vld [vmem:[#allocation8 + $0x20] sm:$0xff]  ;;  %v274_v20 = vld [vmem:[#allocation11] sm:$0xff]  ;;  %p639_p6 = scmp.ne.s32.totalorder %s374_s0, %s638_s25  ;;  %p644_p8 = scmp.lt.s32.totalorder %s638_s25, %s638_s25 }
  0x71   :  { %478 = vmatpush3.bf16.msra.mxu1 %v477_v9  ;;  %470 = vmatprep.subr.bf16.mxu0 %v678_v0  ;;  %v474_v18 = vpack.c.bf16 %v117_v15, %v116_v14  ;;  %v483_v19 = vpack.c.bf16 %v109_v17, %v108_v16  ;;  %v275_v21 = vld [vmem:[#allocation11 + $0x8] sm:$0xff]  ;;  %v118_v22 = vld [vmem:[#allocation10 + $0x30] sm:$0x3]  ;;  %v111_v23 = vld [vmem:[#allocation5] sm:$0x1f] }
  0x72   :  { %479 = vmatprep.subr.bf16.mxu1 %v678_v0  ;;  %v110_v24 = vld [vmem:[#allocation8 + $0x30] sm:$0x3]  ;;  %v103_v25 = vld [vmem:[#allocation2] sm:$0x1f]  ;;  %v486_v26 = vpack.c.bf16 %v275_v21, %v274_v20  ;;  %v276_v27 = vld [vmem:[#allocation11 + $0x10] sm:$0xff]  ;;  %p645_p9 = por %p644_p8, %p643_p7 }
  0x73   :  { %v277_v28 = vld [vmem:[#allocation11 + $0x18] sm:$0xff]  ;;  %v278_v30 = vld [vmem:[#allocation11 + $0x20] sm:$0xff]  ;;  %v279_v31 = vld [vmem:[#allocation11 + $0x28] sm:$0xff] }
  0x74   :  { %472 = vmatpush3.bf16.msra.mxu0 %v471_v12  ;;  %v489_v29 = vpack.c.bf16 %v277_v28, %v276_v27  ;;  %v492_v32 = vpack.c.bf16 %v279_v31, %v278_v30  ;;  %v280_v33 = vld [vmem:[#allocation11 + $0x30] sm:$0x3]  ;;  %v273_v34 = vld [vmem:[#allocation7] sm:$0x1f]  ;;  %v391_v41 = vld [vmem:[%s847_s6] ss:$0 sm:$0xff]  ;;  %p646_p10 = pnand %p645_p9, %p639_p6 }
  0x75   :  { %481 = vmatpush3.bf16.msra.mxu1 %v480_v13  ;;  %473 = vmatprep.subr.bf16.mxu0 %v678_v0 }
  0x76   :  { %482 = vmatprep.subr.bf16.mxu1 %v678_v0 }
  0x78   :  { %475 = vmatpush3.bf16.msra.mxu0 %v474_v18 }
  0x79   :  { %484 = vmatpush3.bf16.msra.mxu1 %v483_v19  ;;  %428 = vmatprep.subr.mxu0 %v680_v1 }
  0x7a   :  { %445 = vmatprep.subr.mxu1 %v680_v1 }
  0x7c   :  { %429 = vmatpush3.msk.msra.mxu0 %vm123_vm1, %v118_v22 }
  0x7d   :  { %431 = vmatmul.mubr.msk.f32.vlgmr.msra.gmra.mrb[0].mxu0 %vm119_vm2, %v111_v23  ;;  %446 = vmatpush3.msk.msra.mxu1 %vm123_vm1, %v110_v24 }
  0x7e   :  { %485 = vmatprep.subr.bf16.mxu0 %v678_v0  ;;  %448 = vmatmul.mubr.msk.f32.vlgmr.msra.gmra.mrb[0].mxu1 %vm119_vm2, %v103_v25 }
  0x7f   :  { %487 = vmatpush3.bf16.msra.mxu0 %v486_v26  ;;  %464 = vmatprep.mubr.msk.f32.mxu0 %vm679_vm0, %v680_v1 }
  0x80   :  { %488 = vmatprep.subr.bf16.mxu0 %v678_v0 }
  0x83   :  { %490 = vmatpush3.bf16.msra.mxu0 %v489_v29 }
  0x84   :  { %491 = vmatprep.subr.bf16.mxu0 %v678_v0 }
  0x87   :  { %493 = vmatpush3.bf16.msra.mxu0 %v492_v32 }
  0x88   :  { %462 = vmatprep.subr.mxu0 %v680_v1 }
  0x8b   :  { %463 = vmatpush3.msk.msra.mxu0 %vm123_vm1, %v280_v33 }
  0x8c   :  { %465 = vmatmul.mubr.msk.f32.vlgmr.msra.gmra.mrb[2].mxu0 %vm119_vm2, %v273_v34 }
 0x150   :  { %v193_v35 = vpop.f32.mrb[0].mxu0 }
 0x151   :  { %v432_v36 = vpop.f32.mrb[1].mxu0  ;;  %v269_v37 = vpop.f32.mrb[0].mxu1 }
 0x152   :  { %v270_v38 = vadd.f32 %v269_v37, %v193_v35  ;;  %v449_v39 = vpop.f32.mrb[1].mxu1 }
 0x15f   :  { %v353_v40 = vpop.f32.mrb[2].mxu0 }
 0x160   :  { %v357_v42 = vadd.f32 %v353_v40, %v270_v38  ;;  %v466_v43 = vpop.f32.mrb[3].mxu0 }
 0x162   :  { %v365_v44 = vadd.f32 %v391_v41, %v357_v42 }
 0x164   :  { %366 = vst [vmem:[#allocation13] sm:$0x1f] %v365_v44 }
 0x165   :  { %649 = shalt.err (!%p646_p10)
}
 0x166   :  { %s650_s29 = scalar_lea.hbm %s848_s7, 128 }
 0x167   :  { %p651_p11 = scmp.ne.s32.totalorder %s848_s7, %s650_s29  ;;  %p654_p12 = scmp.lt.u32.totalorder %s650_s29, %s848_s7 }
 0x169   :  { %p656_p13 = pnand %p654_p12, %p651_p11 }
 0x16b   :  { %659 = shalt.err (!%p656_p13)
}
 0x16c   :  { %376 = dma.vmem_to_hbm [thread:$0]  %s374_s0, 128, %s848_s7, [#allocation4]  }
 0x16d   :  { %668 = dma.done.wait [#allocation4], 128  }
 0x16e   :  { %669 = vsyncadd [#allocation4], 4294967168 }
 0x16f   :  { %380 = vsyncpa [#allocation3], 1 }
 0x170   :  { %381 = vsyncpa [#allocation6], 1 }
 0x171   :  { %382 = vsyncpa [#allocation9], 1 }
 0x172   :  { %383 = vsyncpa [#allocation12], 1 }
 0x173   :  { %384 = vsyncpa [#allocation4], 1 }

</bundles_post_ra>
